<compile_context>
chip_gen: v6e
topology: v6e:2x2x1
jax: 0.10.0
libtpu: 0.0.40
codegen_flags: <defaults>
</compile_context>

<pallas_src>
import math

import jax
import jax.numpy as jnp
from jax.experimental import pallas as pl
from jax.experimental.pallas import tpu as pltpu


ALPHA = 1.942
R0 = 0.742

_A = 0.05
_B = 0.3
_C = 0.05
_DAB = 4.746
_DBC = 4.746
_DAC = 3.445

# constant-folded scalars
_INV_1A = 1.0 / (1.0 + _A)
_INV_1B = 1.0 / (1.0 + _B)
_INV_1C = 1.0 / (1.0 + _C)
_E_NEG_ALPHA_R0 = math.exp(-ALPHA * R0)   # exp(-ALPHA*(rAB+rBC-R0)) = e1_AB*e1_BC*this

_LANES = 128


def _leps_kernel(xy_ref, o_ref):
    x = xy_ref[0]   # (bm, 128) rAB
    y = xy_ref[1]   # (bm, 128) rBC

    # --- shared exponentials: 2 EUP exps per element total -------------------
    e1_ab = jnp.exp(-ALPHA * (x - R0))
    e1_bc = jnp.exp(-ALPHA * (y - R0))
    e1_ac = (e1_ab * e1_bc) * _E_NEG_ALPHA_R0      # = exp(-ALPHA*(x + y - R0))

    e2_ab = e1_ab * e1_ab
    e2_bc = e1_bc * e1_bc
    e2_ac = e1_ac * e1_ac

    # Q(d, r)/(1+k) = (0.5*d/(1+k)) * (1.5*e2 - e1)
    def q(d, e1, e2, inv):
        return (0.5 * d * inv) * (1.5 * e2 - e1)

    # J(d, r)/(1+k) = (0.25*d/(1+k)) * (e2 - 6*e1)
    def j(d, e1, e2, inv):
        return (0.25 * d * inv) * (e2 - 6.0 * e1)

    jab = j(_DAB, e1_ab, e2_ab, _INV_1A)
    jbc = j(_DBC, e1_bc, e2_bc, _INV_1B)
    jac = j(_DAC, e1_ac, e2_ac, _INV_1C)

    q_sum = (q(_DAB, e1_ab, e2_ab, _INV_1A)
             + q(_DBC, e1_bc, e2_bc, _INV_1B)
             + q(_DAC, e1_ac, e2_ac, _INV_1C))

    j_term = (jab * jab + jbc * jbc + jac * jac
              - jab * jbc - jbc * jac - jab * jac)
    # mathematically >= 0 (== ((jab-jbc)^2 + (jbc-jac)^2 + (jab-jac)^2)/2);
    # clamp to guard against FP rounding producing NaN from sqrt.
    j_term = jnp.maximum(j_term, 0.0)

    o_ref[...] = q_sum - jnp.sqrt(j_term)


def leps_forward(xyz, block_m=512):
    """Pallas implementation of leps.forward."""
    xyz = jnp.asarray(xyz, dtype=jnp.float32)
    if xyz.ndim == 1:
        xyz = xyz[None, ...]
    n = xyz.shape[0]

    # pad N up so rows form full (bm, 128) tiles (bm a multiple of 8)
    m = pl.cdiv(n, _LANES)                       # sublane rows needed
    bm = max(8, min(block_m, ((m + 7) // 8) * 8))
    m_pad = ((m + bm - 1) // bm) * bm
    n_pad = m_pad * _LANES
    grid = (m_pad // bm,)

    # single transposed + padded input: (2, m_pad, 128); pad lanes with R0
    # (benign: finite energy, sliced off below).
    xy = jnp.transpose(xyz, (1, 0))                                   # (2, n)
    xy = jnp.pad(xy, ((0, 0), (0, n_pad - n)), constant_values=R0)    # (2, n_pad)
    xy = xy.reshape(2, m_pad, _LANES)

    out = pl.pallas_call(
        _leps_kernel,
        out_shape=jax.ShapeDtypeStruct((m_pad, _LANES), jnp.float32),
        grid=grid,
        in_specs=[pl.BlockSpec((2, bm, _LANES), lambda i: (0, i, 0))],
        out_specs=pl.BlockSpec((bm, _LANES), lambda i: (i, 0)),
        compiler_params=pltpu.CompilerParams(
            dimension_semantics=("parallel",),
        ),
    )(xy)

    return out.reshape(n_pad)[:n]


def _leps_reference(xyz):
    """Pure-JAX reference mirroring the PyTorch code (for sanity check)."""
    xyz = jnp.asarray(xyz, dtype=jnp.float32)
    if xyz.ndim == 1:
        xyz = xyz[None, ...]
    x = xyz[:, 0]
    y = xyz[:, 1]
    a, b, c = 0.05, 0.3, 0.05
    dAB, dBC, dAC = 4.746, 4.746, 3.445

    def Q(d, r):
        return d * (3 * jnp.exp(-2 * ALPHA * (r - R0)) / 2
                    - jnp.exp(-ALPHA * (r - R0))) / 2

    def J(d, r):
        return d * (jnp.exp(-2 * ALPHA * (r - R0))
                    - 6 * jnp.exp(-ALPHA * (r - R0))) / 4

    rAB, rBC = x, y
    rAC = rAB + rBC
    JABred = J(dAB, rAB) / (1 + a)
    JBCred = J(dBC, rBC) / (1 + b)
    JACred = J(dAC, rAC) / (1 + c)
    return (Q(dAB, rAB) / (1 + a) + Q(dBC, rBC) / (1 + b)
            + Q(dAC, rAC) / (1 + c)
            - jnp.sqrt(JABred * JABred + JBCred * JBCred + JACred * JACred
                       - JABred * JBCred - JBCred * JACred - JABred * JACred))


if __name__ == "__main__":
    key = jax.random.PRNGKey(0)
    # small batch of 2-D coordinates (rAB, rBC), positive bond lengths
    xyz = jax.random.uniform(key, (8, 2), dtype=jnp.float32,
                             minval=0.5, maxval=2.5)

    energy = leps_forward(xyz)
    jax.block_until_ready(energy)
    ref = _leps_reference(xyz)
    assert energy.shape == (8,)
    assert jnp.allclose(energy, ref, rtol=1e-5, atol=1e-5)

    # non-multiple-of-128 batch exercises the padding / slicing path
    key2 = jax.random.PRNGKey(1)
    xyz2 = jax.random.uniform(key2, (37, 2), dtype=jnp.float32,
                              minval=0.5, maxval=2.5)
    e2 = leps_forward(xyz2)
    jax.block_until_ready(e2)
    assert e2.shape == (37,)
    assert jnp.allclose(e2, _leps_reference(xyz2), rtol=1e-5, atol=1e-5)

    # also exercise the 1-D input path (promoted to batch of 1)
    e1 = leps_forward(xyz[0])
    jax.block_until_ready(e1)
    assert e1.shape == (1,)
    assert jnp.allclose(e1, _leps_reference(xyz[0]), rtol=1e-5, atol=1e-5)

    print("KERNEL_OK")
</pallas_src>

<mosaic_0001>
module attributes {stable_mosaic.version = 11 : i64} {
  func.func @_leps_kernel(%arg0: i32, %arg1: memref<2x8x128xf32, #tpu.memory_space<vmem>>, %arg2: memref<8x128xf32, #tpu.memory_space<vmem>>) attributes {dimension_semantics = [#tpu.dimension_semantics<parallel>], iteration_bounds = array<i64: 1>, scalar_prefetch = 0 : i64, scratch_operands = 0 : i64, tpu.core_type = #tpu.core_type<tc>, window_params = [{transform_indices = @transform_0, window_bounds = array<i64: 2, 8, 128>}, {transform_indices = @transform_1, window_bounds = array<i64: 8, 128>}]} {
    %c0 = arith.constant 0 : index
    %c0_0 = arith.constant 0 : index
    %c0_1 = arith.constant 0 : index
    %0 = vector.load %arg1[%c0, %c0_0, %c0_1] : memref<2x8x128xf32, #tpu.memory_space<vmem>>, vector<1x8x128xf32>
    %1 = vector.shape_cast %0 : vector<1x8x128xf32> to vector<8x128xf32>
    %c1 = arith.constant 1 : index
    %c0_2 = arith.constant 0 : index
    %c0_3 = arith.constant 0 : index
    %2 = vector.load %arg1[%c1, %c0_2, %c0_3] : memref<2x8x128xf32, #tpu.memory_space<vmem>>, vector<1x8x128xf32>
    %3 = vector.shape_cast %2 : vector<1x8x128xf32> to vector<8x128xf32>
    %cst = arith.constant 7.420000e-01 : f32
    %4 = vector.broadcast %cst : f32 to vector<8x128xf32>
    %5 = arith.subf %1, %4 : vector<8x128xf32>
    %cst_4 = arith.constant -1.942000e+00 : f32
    %6 = vector.broadcast %cst_4 : f32 to vector<8x128xf32>
    %7 = arith.mulf %6, %5 : vector<8x128xf32>
    %8 = math.exp %7 : vector<8x128xf32>
    %cst_5 = arith.constant 7.420000e-01 : f32
    %9 = vector.broadcast %cst_5 : f32 to vector<8x128xf32>
    %10 = arith.subf %3, %9 : vector<8x128xf32>
    %cst_6 = arith.constant -1.942000e+00 : f32
    %11 = vector.broadcast %cst_6 : f32 to vector<8x128xf32>
    %12 = arith.mulf %11, %10 : vector<8x128xf32>
    %13 = math.exp %12 : vector<8x128xf32>
    %14 = arith.mulf %8, %13 : vector<8x128xf32>
    %cst_7 = arith.constant 0.236699477 : f32
    %15 = vector.broadcast %cst_7 : f32 to vector<8x128xf32>
    %16 = arith.mulf %14, %15 : vector<8x128xf32>
    %17 = arith.mulf %8, %8 : vector<8x128xf32>
    %18 = arith.mulf %13, %13 : vector<8x128xf32>
    %19 = arith.mulf %16, %16 : vector<8x128xf32>
    %cst_8 = arith.constant 6.000000e+00 : f32
    %20 = vector.broadcast %cst_8 : f32 to vector<8x128xf32>
    %21 = arith.mulf %20, %8 : vector<8x128xf32>
    %22 = arith.subf %17, %21 : vector<8x128xf32>
    %cst_9 = arith.constant 1.130000e+00 : f32
    %23 = vector.broadcast %cst_9 : f32 to vector<8x128xf32>
    %24 = arith.mulf %23, %22 : vector<8x128xf32>
    %cst_10 = arith.constant 6.000000e+00 : f32
    %25 = vector.broadcast %cst_10 : f32 to vector<8x128xf32>
    %26 = arith.mulf %25, %13 : vector<8x128xf32>
    %27 = arith.subf %18, %26 : vector<8x128xf32>
    %cst_11 = arith.constant 0.912692308 : f32
    %28 = vector.broadcast %cst_11 : f32 to vector<8x128xf32>
    %29 = arith.mulf %28, %27 : vector<8x128xf32>
    %cst_12 = arith.constant 6.000000e+00 : f32
    %30 = vector.broadcast %cst_12 : f32 to vector<8x128xf32>
    %31 = arith.mulf %30, %16 : vector<8x128xf32>
    %32 = arith.subf %19, %31 : vector<8x128xf32>
    %cst_13 = arith.constant 0.820238113 : f32
    %33 = vector.broadcast %cst_13 : f32 to vector<8x128xf32>
    %34 = arith.mulf %33, %32 : vector<8x128xf32>
    %cst_14 = arith.constant 1.500000e+00 : f32
    %35 = vector.broadcast %cst_14 : f32 to vector<8x128xf32>
    %36 = arith.mulf %35, %17 : vector<8x128xf32>
    %37 = arith.subf %36, %8 : vector<8x128xf32>
    %cst_15 = arith.constant 2.260000e+00 : f32
    %38 = vector.broadcast %cst_15 : f32 to vector<8x128xf32>
    %39 = arith.mulf %38, %37 : vector<8x128xf32>
    %cst_16 = arith.constant 1.500000e+00 : f32
    %40 = vector.broadcast %cst_16 : f32 to vector<8x128xf32>
    %41 = arith.mulf %40, %18 : vector<8x128xf32>
    %42 = arith.subf %41, %13 : vector<8x128xf32>
    %cst_17 = arith.constant 1.82538462 : f32
    %43 = vector.broadcast %cst_17 : f32 to vector<8x128xf32>
    %44 = arith.mulf %43, %42 : vector<8x128xf32>
    %45 = arith.addf %39, %44 : vector<8x128xf32>
    %cst_18 = arith.constant 1.500000e+00 : f32
    %46 = vector.broadcast %cst_18 : f32 to vector<8x128xf32>
    %47 = arith.mulf %46, %19 : vector<8x128xf32>
    %48 = arith.subf %47, %16 : vector<8x128xf32>
    %cst_19 = arith.constant 1.64047623 : f32
    %49 = vector.broadcast %cst_19 : f32 to vector<8x128xf32>
    %50 = arith.mulf %49, %48 : vector<8x128xf32>
    %51 = arith.addf %45, %50 : vector<8x128xf32>
    %52 = arith.mulf %24, %24 : vector<8x128xf32>
    %53 = arith.mulf %29, %29 : vector<8x128xf32>
    %54 = arith.addf %52, %53 : vector<8x128xf32>
    %55 = arith.mulf %34, %34 : vector<8x128xf32>
    %56 = arith.addf %54, %55 : vector<8x128xf32>
    %57 = arith.mulf %24, %29 : vector<8x128xf32>
    %58 = arith.subf %56, %57 : vector<8x128xf32>
    %59 = arith.mulf %29, %34 : vector<8x128xf32>
    %60 = arith.subf %58, %59 : vector<8x128xf32>
    %61 = arith.mulf %24, %34 : vector<8x128xf32>
    %62 = arith.subf %60, %61 : vector<8x128xf32>
    %cst_20 = arith.constant 0.000000e+00 : f32
    %63 = vector.broadcast %cst_20 : f32 to vector<8x128xf32>
    %64 = arith.maximumf %62, %63 : vector<8x128xf32>
    %65 = math.sqrt %64 : vector<8x128xf32>
    %66 = arith.subf %51, %65 : vector<8x128xf32>
    %c0_21 = arith.constant 0 : index
    %c0_22 = arith.constant 0 : index
    %67 = vector.load %arg2[%c0_21, %c0_22] : memref<8x128xf32, #tpu.memory_space<vmem>>, vector<8x128xf32>
    tpu.vector_store %arg2[%c0_21, %c0_22], %66 {strides = array<i32>} : memref<8x128xf32, #tpu.memory_space<vmem>>, vector<8x128xf32>,
    return
  }
  func.func @transform_0(%arg0: i32) -> (i32, i32, i32) {
    %c0_i32 = arith.constant 0 : i32
    %c0_i32_0 = arith.constant 0 : i32
    %c0_i32_1 = arith.constant 0 : i32
    return %c0_i32, %arg0, %c0_i32_0 : i32, i32, i32
  }
  func.func @transform_1(%arg0: i32) -> (i32, i32) {
    %c0_i32 = arith.constant 0 : i32
    %c0_i32_0 = arith.constant 0 : i32
    return %arg0, %c0_i32 : i32, i32
  }
}

</mosaic_0001>

<bundles_post_ra>
// kernel: tpu_custom_call.1
= control target key start
LH: loop header
LB: loop body
LE: loop exit
PB: predicated region body
PF: predicated region fallthrough
CT: control target
= control target key end

     0   :  { %6 = vsyncpa [#allocation3], 0  ;;  %s171_s0 = inlined_call_operand.hbm [shape: f32[2,8,128], index: 0, kind: input, shape index: {}]   ;;  %s172_s1 = inlined_call_operand.hbm [shape: f32[8,128], index: 1, kind: output, shape index: {}]  }
   0x1   :  { %7 = vsyncpa [#allocation4], 0  ;;  %s151_s6 = smov [#allocation2]  }
   0x2   :  { %s13_s7 = sshll.u32 %s151_s6, 4  ;;  %s14_s7 = int_to_ptr.vmem [resolvable:$true] %s13_s7 }
   0x3   :  { %s115_s8 = scalar_lea.vmem %s14_s7, 256  ;;  %p120_p1 = scmp.lt.s32.totalorder %s14_s7, %s14_s7 }
   0x4   :  { %p116_p0 = scmp.ne.s32.totalorder %s14_s7, %s115_s8  ;;  %p121_p2 = scmp.lt.s32.totalorder %s115_s8, %s115_s8 }
   0x6   :  { %p122_p3 = por %p121_p2, %p120_p1 }
   0x8   :  { %p123_p4 = pnand %p122_p3, %p116_p0 }
   0xa   :  { %126 = shalt.err (!%p123_p4)
}
   0xb   :  { %s152_s9 = smov 128   ;;  %s153_s10 = smov 8  }
   0xc   :  { %19 = dma.hbm_to_vmem [thread:$0]  %s171_s0, 256, %s14_s7, [#allocation3], %s152_s9, %s152_s9, %s153_s10  }
   0xd   :  { %147 = dma.done.wait [#allocation3], 256  }
   0xe   :  { %148 = vsyncadd [#allocation3], 4294967040  ;;  %v23_v0 = vld [vmem:[#allocation2] sm:$0xff]  ;;  %v25_v1 = vld [vmem:[#allocation2 + $0x8] sm:$0xff]  ;;  %s154_s0 = smov [#allocation5]  }
   0xf   :  { %v95_v2 = vadd.f32 -0.742, %v23_v0  ;;  %v96_v3 = vadd.f32 -0.742, %v25_v1  ;;  %s86_s13 = sshll.u32 %s154_s0, 4  ;;  %s87_s13 = int_to_ptr.vmem [resolvable:$true] %s86_s13 }
  0x10   :  { %s127_s14 = scalar_lea.vmem %s87_s13, 128  ;;  %p132_p6 = scmp.lt.s32.totalorder %s87_s13, %s87_s13 }
  0x11   :  { %v27_v4 = vmul.f32 -1.942, %v95_v2  ;;  %v31_v5 = vmul.f32 -1.942, %v96_v3  ;;  %p128_p5 = scmp.ne.s32.totalorder %s87_s13, %s127_s14  ;;  %p133_p7 = scmp.lt.s32.totalorder %s127_s14, %s127_s14 }
  0x13   :  { %v28_v6 = vmul.f32 1.442695, %v27_v4  ;;  %v32_v7 = vmul.f32 1.442695, %v31_v5  ;;  %p134_p8 = por %p133_p7, %p132_p6 }
  0x15   :  { %101 = vpow2.f32 %v28_v6  ;;  %p135_p9 = pnand %p134_p8, %p128_p5 }
  0x16   :  { %103 = vpow2.f32 %v32_v7 }
  0x22   :  { %v102_v8 = vpop.eup %101 }
  0x23   :  { %v104_v9 = vpop.eup %103  ;;  %v36_v10 = vmul.f32 %v102_v8, %v102_v8  ;;  %v39_v11 = vmul.f32 6.0, %v102_v8 }
  0x24   :  { %v34_v12 = vmul.f32 %v104_v9, %v102_v8  ;;  %v37_v13 = vmul.f32 %v104_v9, %v104_v9  ;;  %v42_v14 = vmul.f32 6.0, %v104_v9 }
  0x25   :  { %v40_v15 = vsub.f32 %v36_v10, %v39_v11  ;;  %v48_v35 = vmul.f32 1.5, %v36_v10 }
  0x26   :  { %v35_v16 = vmul.f32 0.23669948, %v34_v12  ;;  %v43_v17 = vsub.f32 %v37_v13, %v42_v14  ;;  %v51_v36 = vmul.f32 1.5, %v37_v13 }
  0x27   :  { %v41_v18 = vmul.f32 1.13, %v40_v15  ;;  %v49_v38 = vsub.f32 %v48_v35, %v102_v8 }
  0x28   :  { %v38_v19 = vmul.f32 %v35_v16, %v35_v16  ;;  %v44_v20 = vmul.f32 0.9126923, %v43_v17  ;;  %v45_v21 = vmul.f32 6.0, %v35_v16  ;;  %v52_v39 = vsub.f32 %v51_v36, %v104_v9 }
  0x29   :  { %v59_v22 = vmul.f32 %v41_v18, %v41_v18  ;;  %v50_v41 = vmul.f32 2.26, %v49_v38 }
  0x2a   :  { %v46_v23 = vsub.f32 %v38_v19, %v45_v21  ;;  %v60_v24 = vmul.f32 %v44_v20, %v44_v20  ;;  %v64_v28 = vmul.f32 %v44_v20, %v41_v18  ;;  %v55_v40 = vmul.f32 1.5, %v38_v19 }
  0x2b   :  { %v53_v42 = vmul.f32 1.8253846, %v52_v39 }
  0x2c   :  { %v47_v25 = vmul.f32 0.8202381, %v46_v23  ;;  %v61_v26 = vadd.f32 %v60_v24, %v59_v22  ;;  %v56_v43 = vsub.f32 %v55_v40, %v35_v16 }
  0x2d   :  { %v54_v44 = vadd.f32 %v53_v42, %v50_v41 }
  0x2e   :  { %v62_v27 = vmul.f32 %v47_v25, %v47_v25  ;;  %v66_v30 = vmul.f32 %v47_v25, %v44_v20  ;;  %v68_v32 = vmul.f32 %v47_v25, %v41_v18  ;;  %v57_v45 = vmul.f32 1.6404762, %v56_v43 }
  0x30   :  { %v63_v29 = vadd.f32 %v62_v27, %v61_v26  ;;  %v58_v48 = vadd.f32 %v57_v45, %v54_v44 }
  0x32   :  { %v65_v31 = vsub.f32 %v63_v29, %v64_v28 }
  0x34   :  { %v67_v33 = vsub.f32 %v65_v31, %v66_v30 }
  0x36   :  { %v69_v34 = vsub.f32 %v67_v33, %v68_v32 }
  0x38   :  { %v70_v37 = vmax.f32 %v69_v34, 0.0 }
  0x3a   :  { %105 = vrsqrt.f32 %v70_v37  ;;  %vm73_vm0 = vcmp.eq.f32.partialorder %v70_v37, inf  ;;  %v76_v47 = vand.u32 2147483648, %v70_v37  ;;  %vm75_vm1 = vcmp.eq.f32.partialorder %v70_v37, 0.0 }
  0x47   :  { %v106_v46 = vpop.eup %105 }
  0x48   :  { %v72_v49 = vmul.f32 %v106_v46, %v70_v37 }
  0x4a   :  { %v74_v50 = vsel %vm73_vm0, %v70_v37, %v72_v49 }
  0x4b   :  { %v77_v51 = vsel %vm75_vm1, %v76_v47, %v74_v50 }
  0x4c   :  { %v78_v52 = vsub.f32 %v58_v48, %v77_v51 }
  0x4e   :  { %79 = vst [vmem:[#allocation5] sm:$0xff] %v78_v52 }
  0x4f   :  { %138 = shalt.err (!%p135_p9)
}
  0x50   :  { %89 = dma.vmem_to_hbm [thread:$0]  %s87_s13, 128, %s172_s1, [#allocation4]  }
  0x51   :  { %149 = dma.done.wait [#allocation4], 128  }
  0x52   :  { %150 = vsyncadd [#allocation4], 4294967168 }
  0x53   :  { %93 = vsyncpa [#allocation3], 1 }
  0x54   :  { %94 = vsyncpa [#allocation4], 1 }

</bundles_post_ra>
